<compile_context>
chip_gen: v7x
topology: tpu7x:2x2x1
jax: 0.10.0
libtpu: 0.0.40
codegen_flags: <defaults>
</compile_context>

<pallas_src>
import functools

import jax
import jax.numpy as jnp
from jax import lax
from jax.experimental import pallas as pl
from jax.experimental.pallas import tpu as pltpu

LANES = 128
SUBLANES = 8


def _auto_num_shards():
    """Best-effort TensorCore count (v7x: 2). Falls back to 1 (v5e/v6e)."""
    try:
        info = pltpu.get_tpu_info()
        for name in ("num_cores", "core_count", "num_tensorcores",
                     "tensorcore_count", "cores_per_chip"):
            v = getattr(info, name, None)
            if isinstance(v, int) and v >= 1:
                return v
    except Exception:
        pass
    return 1


def _weighted_l1_kernel(pred_ref, targ_ref, sdf_ref, sum_ref, cnt_ref, *,
                        lambda_weight, sdf_threshold, flow, n_valid,
                        tiles_per_shard, block_rows, chunk_rows):
    s = pl.program_id(0)   # shard index (parallel axis)
    i = pl.program_id(1)   # tile within shard (reduction axis)

    # Output blocks are resident across the reduction axis; zero once/shard.
    @pl.when(i == 0)
    def _():
        sum_ref[...] = jnp.zeros_like(sum_ref)
        cnt_ref[...] = jnp.zeros_like(cnt_ref)

    lam = jnp.float32(lambda_weight)
    thr = jnp.float32(sdf_threshold)

    tile_elems = block_rows * LANES
    t = s * tiles_per_shard + i            # logical (unclamped) tile index
    tile_start = t * tile_elems            # int32: assumes n < 2^31 elements
    remaining = n_valid - tile_start       # valid elements in this tile (<=0 ok)

    num_full_chunks = block_rows // chunk_rows
    rem_rows = block_rows - num_full_chunks * chunk_rows

    def chunk_update(row_off, nrows, masked, accs):
        sum_acc, cnt_acc = accs
        p = pred_ref[pl.ds(row_off, nrows), :].astype(jnp.float32)
        q = targ_ref[pl.ds(row_off, nrows), :].astype(jnp.float32)
        d = sdf_ref[pl.ds(row_off, nrows), :].astype(jnp.float32)

        l1 = jnp.abs(p - q)
        cond = (d > thr) if flow == "inner" else (d < thr)
        wl1 = l1 * jnp.where(cond, lam, jnp.float32(1.0))
        nz = (wl1 != 0.0).astype(jnp.float32)

        if masked:
            # Only the boundary / clamped tiles pay for this.
            row_iota = lax.broadcasted_iota(jnp.int32, (nrows, LANES), 0)
            lane_iota = lax.broadcasted_iota(jnp.int32, (nrows, LANES), 1)
            in_tile = (row_off + row_iota) * LANES + lane_iota
            valid = in_tile < remaining
            wl1 = jnp.where(valid, wl1, 0.0)
            nz = jnp.where(valid, nz, 0.0)

        # Fold (nrows, 128) -> (8, 128) with pure vector adds (nrows % 8 == 0).
        sum_acc = sum_acc + jnp.sum(
            wl1.reshape(nrows // SUBLANES, SUBLANES, LANES), axis=0)
        cnt_acc = cnt_acc + jnp.sum(
            nz.reshape(nrows // SUBLANES, SUBLANES, LANES), axis=0)
        return sum_acc, cnt_acc

    def run(masked):
        accs = (jnp.zeros((SUBLANES, LANES), jnp.float32),
                jnp.zeros((SUBLANES, LANES), jnp.float32))
        if num_full_chunks == 1:
            accs = chunk_update(0, chunk_rows, masked, accs)
        elif num_full_chunks > 1:
            def body(c, a):
                off = pl.multiple_of(c * chunk_rows, chunk_rows)
                return chunk_update(off, chunk_rows, masked, a)
            accs = lax.fori_loop(0, num_full_chunks, body, accs, unroll=True)
        if rem_rows > 0:
            accs = chunk_update(num_full_chunks * chunk_rows, rem_rows,
                                masked, accs)
        sum_acc, cnt_acc = accs
        sum_ref[...] += sum_acc
        cnt_ref[...] += cnt_acc

    # Fast path: tile entirely in bounds — no iotas, no selects.
    @pl.when(remaining >= tile_elems)
    def _():
        run(masked=False)

    # Masked path: boundary tile or clamped shard tile past the end.
    @pl.when(remaining < tile_elems)
    def _():
        run(masked=True)


def custom_weighted_l1_loss(predictions, targets, additional_param,
                            lambda_weight=0.1, sdf_threshold=0.0001,
                            flow="inner", block_rows=4096, chunk_rows=512,
                            num_shards=None):
    if flow not in ("inner", "outer"):
        raise ValueError("flow must be inner or outer")

    pred = jnp.asarray(predictions).reshape(-1)
    targ = jnp.asarray(targets).reshape(-1)
    sdf = jnp.asarray(additional_param).reshape(-1)
    n = pred.shape[0]

    out_dtype = jnp.promote_types(jnp.promote_types(pred.dtype, targ.dtype),
                                  sdf.dtype)
    if not jnp.issubdtype(out_dtype, jnp.floating):
        out_dtype = jnp.float32

    if n == 0:
        return jnp.zeros((), out_dtype)

    # Lane-dense (rows, 128) view; pad only when n % 128 != 0 or n < 1024
    # (pad < 1 KiB of zeros, masked in-kernel anyway).
    rows = pl.cdiv(n, LANES)
    padded_rows = max(rows, SUBLANES)
    padded_n = padded_rows * LANES

    def to2d(x):
        if padded_n != n:
            x = jnp.pad(x, (0, padded_n - n))
        return x.reshape(padded_rows, LANES)

    pred2, targ2, sdf2 = to2d(pred), to2d(targ), to2d(sdf)

    # Tile / chunk sizing (both kept multiples of 8 sublanes).
    block_rows = max(SUBLANES,
                     (min(int(block_rows), padded_rows) // SUBLANES) * SUBLANES)
    chunk_rows = max(SUBLANES,
                     (min(int(chunk_rows), block_rows) // SUBLANES) * SUBLANES)

    total_tiles = pl.cdiv(padded_rows, block_rows)
    if num_shards is None:
        num_shards = _auto_num_shards()
    num_shards = max(1, min(int(num_shards), total_tiles))
    tiles_per_shard = pl.cdiv(total_tiles, num_shards)

    def in_map(s, i):
        # Clamp tiles a shard owns logically but that lie past the end;
        # the kernel masks them out via the unclamped tile index.
        return (jnp.minimum(s * tiles_per_shard + i, total_tiles - 1), 0)

    tile_spec = pl.BlockSpec((block_rows, LANES), in_map)
    out_spec = pl.BlockSpec((SUBLANES, LANES), lambda s, i: (s, 0))

    kernel = functools.partial(
        _weighted_l1_kernel,
        lambda_weight=float(lambda_weight),
        sdf_threshold=float(sdf_threshold),
        flow=flow,
        n_valid=n,
        tiles_per_shard=tiles_per_shard,
        block_rows=block_rows,
        chunk_rows=chunk_rows,
    )

    sum_out, cnt_out = pl.pallas_call(
        kernel,
        out_shape=(
            jax.ShapeDtypeStruct((num_shards * SUBLANES, LANES), jnp.float32),
            jax.ShapeDtypeStruct((num_shards * SUBLANES, LANES), jnp.float32),
        ),
        grid_spec=pltpu.PrefetchScalarGridSpec(
            num_scalar_prefetch=0,
            grid=(num_shards, tiles_per_shard),
            in_specs=[tile_spec, tile_spec, tile_spec],
            out_specs=(out_spec, out_spec),
        ),
        compiler_params=pltpu.CompilerParams(
            dimension_semantics=("parallel", "arbitrary"),
            vmem_limit_bytes=32 * 1024 * 1024),
    )(pred2, targ2, sdf2)

    total = jnp.sum(sum_out)
    count = jnp.sum(cnt_out)
    # Matches torch: mean over non-zero weighted-L1 elements, or 0.0 if none.
    loss = jnp.where(count > 0, total / jnp.maximum(count, 1.0),
                     jnp.float32(0.0))
    return loss.astype(out_dtype)


def _reference(pred, targ, sdf, lambda_weight=0.1, sdf_threshold=0.0001,
               flow="inner"):
    pred = jnp.asarray(pred, jnp.float32)
    targ = jnp.asarray(targ, jnp.float32)
    sdf = jnp.asarray(sdf, jnp.float32)
    l1 = jnp.abs(pred - targ)
    if flow == "inner":
        w = jnp.where(sdf > sdf_threshold, lambda_weight, 1.0)
    else:
        w = jnp.where(sdf < sdf_threshold, lambda_weight, 1.0)
    wl1 = l1 * w
    nz = wl1 != 0
    cnt = jnp.sum(nz)
    return jnp.where(cnt > 0, jnp.sum(wl1) / jnp.maximum(cnt, 1), 0.0)


if __name__ == "__main__":
    key = jax.random.PRNGKey(0)
    k1, k2, k3 = jax.random.split(key, 3)

    # 1) Small NCHW example, 'inner' and 'outer' flows (fast path, single tile).
    shape = (2, 4, 16, 16)
    predictions = jax.random.normal(k1, shape, jnp.float32)
    targets = jax.random.normal(k2, shape, jnp.float32)
    additional_param = jax.random.normal(k3, shape, jnp.float32) * 0.01

    loss = jax.block_until_ready(
        custom_weighted_l1_loss(predictions, targets, additional_param,
                                lambda_weight=0.1, sdf_threshold=0.0001,
                                flow="inner"))
    ref = _reference(predictions, targets, additional_param)
    assert jnp.allclose(loss, ref, rtol=1e-5, atol=1e-6), (loss, ref)

    loss_outer = jax.block_until_ready(
        custom_weighted_l1_loss(predictions, targets, additional_param,
                                flow="outer"))
    ref_outer = _reference(predictions, targets, additional_param,
                           flow="outer")
    assert jnp.allclose(loss_outer, ref_outer, rtol=1e-5, atol=1e-6)

    # 2) Ragged element count (n % 128 != 0): exercises the boundary-tile
    #    masked path, the clamped shard index_map, multi-tile grid and the
    #    chunked inner loop with a remainder chunk.
    shape2 = (2, 5, 31, 33)  # 10230 elements
    p2 = jax.random.normal(k1, shape2, jnp.float32)
    t2 = jax.random.normal(k2, shape2, jnp.float32)
    s2 = jax.random.normal(k3, shape2, jnp.float32) * 0.01
    loss2 = jax.block_until_ready(
        custom_weighted_l1_loss(p2, t2, s2, flow="inner",
                                block_rows=48, chunk_rows=16, num_shards=2))
    ref2 = _reference(p2, t2, s2)
    assert jnp.allclose(loss2, ref2, rtol=1e-5, atol=1e-6), (loss2, ref2)

    # Same ragged input through the default (large-tile, auto-shard) path.
    loss2b = jax.block_until_ready(
        custom_weighted_l1_loss(p2, t2, s2, flow="inner"))
    assert jnp.allclose(loss2b, ref2, rtol=1e-5, atol=1e-6), (loss2b, ref2)

    # 3) Native bf16 inputs (no host-side upcast copy): kernel casts per chunk.
    p3 = predictions.astype(jnp.bfloat16)
    t3 = targets.astype(jnp.bfloat16)
    loss3 = jax.block_until_ready(
        custom_weighted_l1_loss(p3, t3, additional_param, flow="inner"))
    ref3 = _reference(p3, t3, additional_param)
    assert jnp.allclose(jnp.float32(loss3), ref3, rtol=1e-3, atol=1e-4), (
        loss3, ref3)

    print("KERNEL_OK")
</pallas_src>

<mosaic_0001>
module attributes {stable_mosaic.version = 11 : i64} {
  func.func @_weighted_l1_kernel(%arg0: i32, %arg1: i32, %arg2: memref<16x128xf32, #tpu.memory_space<vmem>>, %arg3: memref<16x128xf32, #tpu.memory_space<vmem>>, %arg4: memref<16x128xf32, #tpu.memory_space<vmem>>, %arg5: memref<8x128xf32, #tpu.memory_space<vmem>>, %arg6: memref<8x128xf32, #tpu.memory_space<vmem>>) attributes {dimension_semantics = [#tpu.dimension_semantics<parallel>, #tpu.dimension_semantics<arbitrary>], iteration_bounds = array<i64: 1, 1>, scalar_prefetch = 0 : i64, scratch_operands = 0 : i64, tpu.core_type = #tpu.core_type<tc>, window_params = [{transform_indices = @transform_0, window_bounds = array<i64: 16, 128>}, {transform_indices = @transform_1, window_bounds = array<i64: 16, 128>}, {transform_indices = @transform_2, window_bounds = array<i64: 16, 128>}, {transform_indices = @transform_3, window_bounds = array<i64: 8, 128>}, {transform_indices = @transform_4, window_bounds = array<i64: 8, 128>}]} {
    %c0_i32 = arith.constant 0 : i32
    %0 = arith.cmpi eq, %arg1, %c0_i32 : i32
    %1 = arith.extui %0 : i1 to i32
    %c0_i32_0 = arith.constant 0 : i32
    %2 = arith.cmpi ne, %1, %c0_i32_0 : i32
    scf.if %2 {
      %cst_9 = arith.constant 0.000000e+00 : f32
      %13 = vector.broadcast %cst_9 : f32 to vector<8x128xf32>
      %c0 = arith.constant 0 : index
      %c0_10 = arith.constant 0 : index
      %14 = vector.load %arg5[%c0, %c0_10] : memref<8x128xf32, #tpu.memory_space<vmem>>, vector<8x128xf32>
      tpu.vector_store %arg5[%c0, %c0_10], %13 {strides = array<i32>} : memref<8x128xf32, #tpu.memory_space<vmem>>, vector<8x128xf32>,
      %cst_11 = arith.constant 0.000000e+00 : f32
      %15 = vector.broadcast %cst_11 : f32 to vector<8x128xf32>
      %c0_12 = arith.constant 0 : index
      %c0_13 = arith.constant 0 : index
      %16 = vector.load %arg6[%c0_12, %c0_13] : memref<8x128xf32, #tpu.memory_space<vmem>>, vector<8x128xf32>
      tpu.vector_store %arg6[%c0_12, %c0_13], %15 {strides = array<i32>} : memref<8x128xf32, #tpu.memory_space<vmem>>, vector<8x128xf32>,
    } else {
    }
    %c1_i32 = arith.constant 1 : i32
    %3 = arith.muli %arg0, %c1_i32 : i32
    %4 = arith.addi %3, %arg1 : i32
    %c2048_i32 = arith.constant 2048 : i32
    %5 = arith.muli %4, %c2048_i32 : i32
    %c2048_i32_1 = arith.constant 2048 : i32
    %6 = arith.subi %c2048_i32_1, %5 : i32
    %c2048_i32_2 = arith.constant 2048 : i32
    %7 = arith.cmpi sge, %6, %c2048_i32_2 : i32
    %8 = arith.extui %7 : i1 to i32
    %cst = arith.constant 9.99999974E-5 : f32
    %cst_3 = arith.constant 1.000000e-01 : f32
    %c0_i32_4 = arith.constant 0 : i32
    %9 = arith.cmpi ne, %8, %c0_i32_4 : i32
    scf.if %9 {
      %cst_9 = arith.constant 0.000000e+00 : f32
      %13 = vector.broadcast %cst_9 : f32 to vector<8x128xf32>
      %cst_10 = arith.constant 0.000000e+00 : f32
      %14 = vector.broadcast %cst_10 : f32 to vector<8x128xf32>
      %c0 = arith.constant 0 : index
      %c0_11 = arith.constant 0 : index
      %15 = vector.load %arg2[%c0, %c0_11] : memref<16x128xf32, #tpu.memory_space<vmem>>, vector<16x128xf32>
      %c0_12 = arith.constant 0 : index
      %c0_13 = arith.constant 0 : index
      %16 = vector.load %arg3[%c0_12, %c0_13] : memref<16x128xf32, #tpu.memory_space<vmem>>, vector<16x128xf32>
      %c0_14 = arith.constant 0 : index
      %c0_15 = arith.constant 0 : index
      %17 = vector.load %arg4[%c0_14, %c0_15] : memref<16x128xf32, #tpu.memory_space<vmem>>, vector<16x128xf32>
      %18 = arith.subf %15, %16 : vector<16x128xf32>
      %19 = math.absf %18 : vector<16x128xf32>
      %20 = vector.broadcast %cst : f32 to vector<16x128xf32>
      %21 = arith.cmpf ogt, %17, %20 : vector<16x128xf32>
      %cst_16 = arith.constant 1.000000e+00 : f32
      %22 = vector.broadcast %cst_3 : f32 to vector<16x128xf32>
      %23 = vector.broadcast %cst_16 : f32 to vector<16x128xf32>
      %24 = arith.select %21, %22, %23 : vector<16x128xi1>, vector<16x128xf32>
      %25 = arith.mulf %19, %24 : vector<16x128xf32>
      %cst_17 = arith.constant 0.000000e+00 : f32
      %26 = vector.broadcast %cst_17 : f32 to vector<16x128xf32>
      %27 = arith.cmpf one, %25, %26 : vector<16x128xf32>
      %28 = arith.extui %27 : vector<16x128xi1> to vector<16x128xi32>
      %29 = arith.sitofp %28 : vector<16x128xi32> to vector<16x128xf32>
      %30 = vector.shape_cast %25 : vector<16x128xf32> to vector<2x8x128xf32>
      %cst_18 = arith.constant dense<0.000000e+00> : vector<8x128xf32>
      %31 = vector.multi_reduction <add>, %30, %cst_18 [0] : vector<2x8x128xf32> to vector<8x128xf32>
      %32 = arith.addf %13, %31 : vector<8x128xf32>
      %33 = vector.shape_cast %29 : vector<16x128xf32> to vector<2x8x128xf32>
      %cst_19 = arith.constant dense<0.000000e+00> : vector<8x128xf32>
      %34 = vector.multi_reduction <add>, %33, %cst_19 [0] : vector<2x8x128xf32> to vector<8x128xf32>
      %35 = arith.addf %14, %34 : vector<8x128xf32>
      %c0_20 = arith.constant 0 : index
      %c0_21 = arith.constant 0 : index
      %36 = vector.load %arg5[%c0_20, %c0_21] : memref<8x128xf32, #tpu.memory_space<vmem>>, vector<8x128xf32>
      %37 = arith.addf %36, %32 : vector<8x128xf32>
      %c0_22 = arith.constant 0 : index
      %c0_23 = arith.constant 0 : index
      %38 = vector.load %arg5[%c0_22, %c0_23] : memref<8x128xf32, #tpu.memory_space<vmem>>, vector<8x128xf32>
      tpu.vector_store %arg5[%c0_22, %c0_23], %37 {strides = array<i32>} : memref<8x128xf32, #tpu.memory_space<vmem>>, vector<8x128xf32>,
      %c0_24 = arith.constant 0 : index
      %c0_25 = arith.constant 0 : index
      %39 = vector.load %arg6[%c0_24, %c0_25] : memref<8x128xf32, #tpu.memory_space<vmem>>, vector<8x128xf32>
      %40 = arith.addf %39, %35 : vector<8x128xf32>
      %c0_26 = arith.constant 0 : index
      %c0_27 = arith.constant 0 : index
      %41 = vector.load %arg6[%c0_26, %c0_27] : memref<8x128xf32, #tpu.memory_space<vmem>>, vector<8x128xf32>
      tpu.vector_store %arg6[%c0_26, %c0_27], %40 {strides = array<i32>} : memref<8x128xf32, #tpu.memory_space<vmem>>, vector<8x128xf32>,
    } else {
    }
    %c2048_i32_5 = arith.constant 2048 : i32
    %10 = arith.cmpi slt, %6, %c2048_i32_5 : i32
    %11 = arith.extui %10 : i1 to i32
    %cst_6 = arith.constant 9.99999974E-5 : f32
    %cst_7 = arith.constant 1.000000e-01 : f32
    %c0_i32_8 = arith.constant 0 : i32
    %12 = arith.cmpi ne, %11, %c0_i32_8 : i32
    scf.if %12 {
      %cst_9 = arith.constant 0.000000e+00 : f32
      %13 = vector.broadcast %cst_9 : f32 to vector<8x128xf32>
      %cst_10 = arith.constant 0.000000e+00 : f32
      %14 = vector.broadcast %cst_10 : f32 to vector<8x128xf32>
      %c0 = arith.constant 0 : index
      %c0_11 = arith.constant 0 : index
      %15 = vector.load %arg2[%c0, %c0_11] : memref<16x128xf32, #tpu.memory_space<vmem>>, vector<16x128xf32>
      %c0_12 = arith.constant 0 : index
      %c0_13 = arith.constant 0 : index
      %16 = vector.load %arg3[%c0_12, %c0_13] : memref<16x128xf32, #tpu.memory_space<vmem>>, vector<16x128xf32>
      %c0_14 = arith.constant 0 : index
      %c0_15 = arith.constant 0 : index
      %17 = vector.load %arg4[%c0_14, %c0_15] : memref<16x128xf32, #tpu.memory_space<vmem>>, vector<16x128xf32>
      %18 = arith.subf %15, %16 : vector<16x128xf32>
      %19 = math.absf %18 : vector<16x128xf32>
      %20 = vector.broadcast %cst_6 : f32 to vector<16x128xf32>
      %21 = arith.cmpf ogt, %17, %20 : vector<16x128xf32>
      %cst_16 = arith.constant 1.000000e+00 : f32
      %22 = vector.broadcast %cst_7 : f32 to vector<16x128xf32>
      %23 = vector.broadcast %cst_16 : f32 to vector<16x128xf32>
      %24 = arith.select %21, %22, %23 : vector<16x128xi1>, vector<16x128xf32>
      %25 = arith.mulf %19, %24 : vector<16x128xf32>
      %cst_17 = arith.constant 0.000000e+00 : f32
      %26 = vector.broadcast %cst_17 : f32 to vector<16x128xf32>
      %27 = arith.cmpf one, %25, %26 : vector<16x128xf32>
      %28 = arith.extui %27 : vector<16x128xi1> to vector<16x128xi32>
      %29 = arith.sitofp %28 : vector<16x128xi32> to vector<16x128xf32>
      %30 = tpu.iota {dimensions = array<i32: 0>} : vector<16x128xi32>
      %31 = tpu.iota {dimensions = array<i32: 1>} : vector<16x128xi32>
      %c0_i32_18 = arith.constant 0 : i32
      %32 = vector.broadcast %c0_i32_18 : i32 to vector<16x128xi32>
      %33 = arith.addi %32, %30 : vector<16x128xi32>
      %c128_i32 = arith.constant 128 : i32
      %34 = vector.broadcast %c128_i32 : i32 to vector<16x128xi32>
      %35 = arith.muli %33, %34 : vector<16x128xi32>
      %36 = arith.addi %35, %31 : vector<16x128xi32>
      %37 = vector.broadcast %6 : i32 to vector<16x128xi32>
      %38 = arith.cmpi slt, %36, %37 : vector<16x128xi32>
      %cst_19 = arith.constant 0.000000e+00 : f32
      %39 = vector.broadcast %cst_19 : f32 to vector<16x128xf32>
      %40 = arith.select %38, %25, %39 : vector<16x128xi1>, vector<16x128xf32>
      %cst_20 = arith.constant 0.000000e+00 : f32
      %41 = vector.broadcast %cst_20 : f32 to vector<16x128xf32>
      %42 = arith.select %38, %29, %41 : vector<16x128xi1>, vector<16x128xf32>
      %43 = vector.shape_cast %40 : vector<16x128xf32> to vector<2x8x128xf32>
      %cst_21 = arith.constant dense<0.000000e+00> : vector<8x128xf32>
      %44 = vector.multi_reduction <add>, %43, %cst_21 [0] : vector<2x8x128xf32> to vector<8x128xf32>
      %45 = arith.addf %13, %44 : vector<8x128xf32>
      %46 = vector.shape_cast %42 : vector<16x128xf32> to vector<2x8x128xf32>
      %cst_22 = arith.constant dense<0.000000e+00> : vector<8x128xf32>
      %47 = vector.multi_reduction <add>, %46, %cst_22 [0] : vector<2x8x128xf32> to vector<8x128xf32>
      %48 = arith.addf %14, %47 : vector<8x128xf32>
      %c0_23 = arith.constant 0 : index
      %c0_24 = arith.constant 0 : index
      %49 = vector.load %arg5[%c0_23, %c0_24] : memref<8x128xf32, #tpu.memory_space<vmem>>, vector<8x128xf32>
      %50 = arith.addf %49, %45 : vector<8x128xf32>
      %c0_25 = arith.constant 0 : index
      %c0_26 = arith.constant 0 : index
      %51 = vector.load %arg5[%c0_25, %c0_26] : memref<8x128xf32, #tpu.memory_space<vmem>>, vector<8x128xf32>
      tpu.vector_store %arg5[%c0_25, %c0_26], %50 {strides = array<i32>} : memref<8x128xf32, #tpu.memory_space<vmem>>, vector<8x128xf32>,
      %c0_27 = arith.constant 0 : index
      %c0_28 = arith.constant 0 : index
      %52 = vector.load %arg6[%c0_27, %c0_28] : memref<8x128xf32, #tpu.memory_space<vmem>>, vector<8x128xf32>
      %53 = arith.addf %52, %48 : vector<8x128xf32>
      %c0_29 = arith.constant 0 : index
      %c0_30 = arith.constant 0 : index
      %54 = vector.load %arg6[%c0_29, %c0_30] : memref<8x128xf32, #tpu.memory_space<vmem>>, vector<8x128xf32>
      tpu.vector_store %arg6[%c0_29, %c0_30], %53 {strides = array<i32>} : memref<8x128xf32, #tpu.memory_space<vmem>>, vector<8x128xf32>,
    } else {
    }
    return
  }
  func.func @transform_0(%arg0: i32, %arg1: i32) -> (i32, i32) {
    %c1_i32 = arith.constant 1 : i32
    %0 = arith.muli %arg0, %c1_i32 : i32
    %1 = arith.addi %0, %arg1 : i32
    %c0_i32 = arith.constant 0 : i32
    %2 = arith.minsi %1, %c0_i32 : i32
    %c0_i32_0 = arith.constant 0 : i32
    %c0_i32_1 = arith.constant 0 : i32
    return %2, %c0_i32_0 : i32, i32
  }
  func.func @transform_1(%arg0: i32, %arg1: i32) -> (i32, i32) {
    %c1_i32 = arith.constant 1 : i32
    %0 = arith.muli %arg0, %c1_i32 : i32
    %1 = arith.addi %0, %arg1 : i32
    %c0_i32 = arith.constant 0 : i32
    %2 = arith.minsi %1, %c0_i32 : i32
    %c0_i32_0 = arith.constant 0 : i32
    %c0_i32_1 = arith.constant 0 : i32
    return %2, %c0_i32_0 : i32, i32
  }
  func.func @transform_2(%arg0: i32, %arg1: i32) -> (i32, i32) {
    %c1_i32 = arith.constant 1 : i32
    %0 = arith.muli %arg0, %c1_i32 : i32
    %1 = arith.addi %0, %arg1 : i32
    %c0_i32 = arith.constant 0 : i32
    %2 = arith.minsi %1, %c0_i32 : i32
    %c0_i32_0 = arith.constant 0 : i32
    %c0_i32_1 = arith.constant 0 : i32
    return %2, %c0_i32_0 : i32, i32
  }
  func.func @transform_3(%arg0: i32, %arg1: i32) -> (i32, i32) {
    %c0_i32 = arith.constant 0 : i32
    %c0_i32_0 = arith.constant 0 : i32
    return %arg0, %c0_i32 : i32, i32
  }
  func.func @transform_4(%arg0: i32, %arg1: i32) -> (i32, i32) {
    %c0_i32 = arith.constant 0 : i32
    %c0_i32_0 = arith.constant 0 : i32
    return %arg0, %c0_i32 : i32, i32
  }
}

</mosaic_0001>

<bundles_post_ra>
// kernel: tpu_custom_call.1
= control target key start
LH: loop header
LB: loop body
LE: loop exit
PB: predicated region body
PF: predicated region fallthrough
CT: control target
= control target key end

     0   :  { %10 = vsyncpa [#allocation3], 0  ;;  %s463_s0 = inlined_call_operand.hbm [shape: f32[16,128], index: 0, kind: input, shape index: {}]   ;;  %s464_s1 = inlined_call_operand.hbm [shape: f32[16,128], index: 1, kind: input, shape index: {}]   ;;  %s465_s2 = inlined_call_operand.hbm [shape: f32[16,128], index: 2, kind: input, shape index: {}]   ;;  %s466_s3 = inlined_call_operand.hbm [shape: f32[8,128], index: 3, kind: output, shape index: {0}]   ;;  %s467_s4 = inlined_call_operand.hbm [shape: f32[8,128], index: 4, kind: output, shape index: {1}]  }
   0x1   :  { %11 = vsyncpa [#allocation6], 0 }
   0x2   :  { %12 = vsyncpa [#allocation4], 0 }
   0x3   :  { %13 = vsyncpa [#allocation10], 0  ;;  %s353_s15 = smov [#allocation5]   ;;  %s354_s17 = smov [#allocation2]  }
   0x4   :  { %s43_s16 = sshll.u32 %s353_s15, 4  ;;  %s25_s18 = sshll.u32 %s354_s17, 4  ;;  %s44_s16 = int_to_ptr.vmem [resolvable:$true] %s43_s16  ;;  %s387_s18 = int_to_ptr.vmem [resolvable:$true] %s25_s18 }
   0x5   :  { %s235_s21 = scalar_lea.hbm %s464_s1, 256 }
   0x6   :  { %p236_p0 = scmp.ne.s32.totalorder %s464_s1, %s235_s21  ;;  %p239_p1 = scmp.lt.u32.totalorder %s235_s21, %s464_s1 }
   0x8   :  { %p241_p2 = pnand %p239_p1, %p236_p0 }
   0xa   :  { %244 = shalt.err (!%p241_p2)
}
   0xb   :  { %s245_s26 = scalar_lea.vmem %s44_s16, 256  ;;  %p250_p4 = scmp.lt.s32.totalorder %s44_s16, %s44_s16 }
   0xc   :  { %p246_p3 = scmp.ne.s32.totalorder %s44_s16, %s245_s26  ;;  %p251_p5 = scmp.lt.s32.totalorder %s245_s26, %s245_s26 }
   0xe   :  { %p252_p6 = por %p251_p5, %p250_p4 }
  0x10   :  { %p253_p7 = pnand %p252_p6, %p246_p3 }
  0x12   :  { %256 = shalt.err (!%p253_p7)
}
  0x13   :  { %s355_s27 = smov 128   ;;  %s356_s28 = smov 8  }
  0x14   :  { %49 = dma.hbm_to_vmem [thread:$0]  %s464_s1, 256, %s44_s16, [#allocation6], %s355_s27, %s355_s27, %s356_s28  }
  0x15   :  { %s257_s7 = scalar_lea.hbm %s463_s0, 256 }
  0x16   :  { %p258_p8 = scmp.ne.s32.totalorder %s463_s0, %s257_s7  ;;  %p261_p9 = scmp.lt.u32.totalorder %s257_s7, %s463_s0 }
  0x18   :  { %p263_p10 = pnand %p261_p9, %p258_p8 }
  0x1a   :  { %266 = shalt.err (!%p263_p10)
}
  0x1b   :  { %s267_s12 = scalar_lea.vmem %s387_s18, 256  ;;  %p272_p12 = scmp.lt.s32.totalorder %s387_s18, %s387_s18 }
  0x1c   :  { %p268_p11 = scmp.ne.s32.totalorder %s387_s18, %s267_s12  ;;  %p273_p13 = scmp.lt.s32.totalorder %s267_s12, %s267_s12 }
  0x1e   :  { %p274_p0 = por %p273_p13, %p272_p12 }
  0x20   :  { %p275_p1 = pnand %p274_p0, %p268_p11 }
  0x22   :  { %278 = shalt.err (!%p275_p1)
}
  0x23   :  { %31 = dma.hbm_to_vmem [thread:$0]  %s463_s0, 256, %s387_s18, [#allocation3], %s355_s27, %s355_s27, %s356_s28  }
  0x24   :  { %s357_s14 = smov [#allocation7]   ;;  %s279_s19 = scalar_lea.hbm %s465_s2, 256 }
  0x25   :  { %s61_s15 = sshll.u32 %s357_s14, 4  ;;  %p280_p2 = scmp.ne.s32.totalorder %s465_s2, %s279_s19  ;;  %s62_s15 = int_to_ptr.vmem [resolvable:$true] %s61_s15 }
  0x26   :  { %p283_p3 = scmp.lt.u32.totalorder %s279_s19, %s465_s2 }
  0x28   :  { %p285_p4 = pnand %p283_p3, %p280_p2 }
  0x2a   :  { %288 = shalt.err (!%p285_p4)
}
  0x2b   :  { %s289_s24 = scalar_lea.vmem %s62_s15, 256  ;;  %p294_p6 = scmp.lt.s32.totalorder %s62_s15, %s62_s15 }
  0x2c   :  { %p290_p5 = scmp.ne.s32.totalorder %s62_s15, %s289_s24  ;;  %p295_p7 = scmp.lt.s32.totalorder %s289_s24, %s289_s24 }
  0x2e   :  { %p296_p8 = por %p295_p7, %p294_p6 }
  0x30   :  { %p297_p9 = pnand %p296_p8, %p290_p5 }
  0x32   :  { %300 = shalt.err (!%p297_p9)
}
  0x33   :  { %67 = dma.hbm_to_vmem [thread:$0]  %s465_s2, 256, %s62_s15, [#allocation6], %s355_s27, %s355_s27, %s356_s28  }
  0x34   :  { %345 = dma.done.wait [#allocation3], 256  }
  0x35   :  { %346 = vsyncadd [#allocation3], 4294967040 }
  0x36   :  { %347 = dma.done.wait [#allocation6], 512  }
  0x37   :  { %348 = vsyncadd [#allocation6], 4294966784  ;;  %v102_v0 = vld [vmem:[#allocation2] sm:$0xff]  ;;  %v103_v1 = vld [vmem:[#allocation2 + $0x8] sm:$0xff]  ;;  %v358_v9 = vmov 1.0   ;;  %s359_s2 = smov [#allocation8]  }
  0x38   :  { %v104_v2 = vld [vmem:[#allocation5] sm:$0xff]  ;;  %v105_v3 = vld [vmem:[#allocation5 + $0x8] sm:$0xff]  ;;  %v106_v4 = vld [vmem:[#allocation7] sm:$0xff]  ;;  %s192_s25 = sshll.u32 %s359_s2, 4  ;;  %v360_v16 = vmov 0.0   ;;  %s361_s26 = smov [#allocation9]   ;;  %s193_s25 = int_to_ptr.vmem [resolvable:$true] %s192_s25 }
  0x39   :  { %v107_v5 = vld [vmem:[#allocation7 + $0x8] sm:$0xff]  ;;  %v108_v6 = vsub.f32 %v102_v0, %v104_v2  ;;  %v109_v7 = vsub.f32 %v103_v1, %v105_v3  ;;  %vm112_vm0 = vcmp.gt.f32.partialorder %v106_v4, 0.0001  ;;  %s202_s27 = sshll.u32 %s361_s26, 4  ;;  %s301_s28 = scalar_lea.vmem %s193_s25, 128  ;;  %s203_s27 = int_to_ptr.vmem [resolvable:$true] %s202_s27 }
  0x3a   :  { %vm113_vm1 = vcmp.gt.f32.partialorder %v107_v5, 0.0001  ;;  %v114_v10 = vsel %vm112_vm0, 0.1, %v358_v9  ;;  %p302_p10 = scmp.ne.s32.totalorder %s193_s25, %s301_s28  ;;  %p306_p11 = scmp.lt.s32.totalorder %s193_s25, %s193_s25 }
  0x3b   :  { %v110_v8 = vand.u32 2147483647, %v108_v6  ;;  %v115_v11 = vsel %vm113_vm1, 0.1, %v358_v9  ;;  %v111_v12 = vand.u32 2147483647, %v109_v7  ;;  %p307_p12 = scmp.lt.s32.totalorder %s301_s28, %s301_s28 }
  0x3d   :  { %v116_v13 = vmul.f32 %v114_v10, %v110_v8  ;;  %v117_v14 = vmul.f32 %v115_v11, %v111_v12  ;;  %p308_p13 = por %p307_p12, %p306_p11 }
  0x3f   :  { %vm118_vm2 = vcmp.ne.f32.partialorder %v116_v13, 0.0  ;;  %v124_v15 = vadd.f32 %v117_v14, %v116_v13  ;;  %vm119_vm3 = vcmp.ne.f32.partialorder %v117_v14, 0.0  ;;  %p309_p0 = pnand %p308_p13, %p302_p10 }
  0x40   :  { %v222_v17 = vsel %vm118_vm2, 1.0, %v360_v16  ;;  %v223_v18 = vsel %vm119_vm3, 1.0, %v360_v16 }
  0x41   :  { %v126_v19 = vadd.f32 %v223_v18, %v222_v17  ;;  %130 = vst [vmem:[#allocation8] sm:$0xff] %v124_v15 }
  0x42   :  { %312 = shalt.err (!%p309_p0)
}
  0x43   :  { %s313_s5 = scalar_lea.hbm %s466_s3, 128 }
  0x44   :  { %p314_p1 = scmp.ne.s32.totalorder %s466_s3, %s313_s5  ;;  %p317_p2 = scmp.lt.u32.totalorder %s313_s5, %s466_s3 }
  0x46   :  { %p319_p3 = pnand %p317_p2, %p314_p1 }
  0x48   :  { %322 = shalt.err (!%p319_p3)
}
  0x49   :  { %195 = dma.vmem_to_hbm [thread:$0]  %s193_s25, 128, %s466_s3, [#allocation4]   ;;  %133 = vst [vmem:[#allocation9] sm:$0xff] %v126_v19 }
  0x4a   :  { %s323_s12 = scalar_lea.vmem %s203_s27, 128  ;;  %p328_p5 = scmp.lt.s32.totalorder %s203_s27, %s203_s27 }
  0x4b   :  { %p324_p4 = scmp.ne.s32.totalorder %s203_s27, %s323_s12  ;;  %p329_p6 = scmp.lt.s32.totalorder %s323_s12, %s323_s12 }
  0x4d   :  { %p330_p7 = por %p329_p6, %p328_p5 }
  0x4f   :  { %p331_p8 = pnand %p330_p7, %p324_p4 }
  0x51   :  { %334 = shalt.err (!%p331_p8)
}
  0x52   :  { %s335_s14 = scalar_lea.hbm %s467_s4, 128 }
  0x53   :  { %p336_p9 = scmp.ne.s32.totalorder %s467_s4, %s335_s14  ;;  %p339_p10 = scmp.lt.u32.totalorder %s335_s14, %s467_s4 }
  0x55   :  { %p341_p11 = pnand %p339_p10, %p336_p9 }
  0x57   :  { %344 = shalt.err (!%p341_p11)
}
  0x58   :  { %205 = dma.vmem_to_hbm [thread:$0]  %s203_s27, 128, %s467_s4, [#allocation10]  }
  0x59   :  { %349 = dma.done.wait [#allocation4], 128  }
  0x5a   :  { %350 = vsyncadd [#allocation4], 4294967168 }
  0x5b   :  { %351 = dma.done.wait [#allocation10], 128  }
  0x5c   :  { %352 = vsyncadd [#allocation10], 4294967168 }
  0x5d   :  { %212 = vsyncpa [#allocation3], 1 }
  0x5e   :  { %213 = vsyncpa [#allocation6], 1 }
  0x5f   :  { %214 = vsyncpa [#allocation4], 1 }
  0x60   :  { %215 = vsyncpa [#allocation10], 1 }

</bundles_post_ra>
